<compile_context>
chip_gen: v6e
topology: v6e:2x2x1
jax: 0.10.0
libtpu: 0.0.40
codegen_flags: <defaults>
</compile_context>

<pallas_src>
import jax
import jax.numpy as jnp
from jax.experimental import pallas as pl
from jax.experimental.pallas import tpu as pltpu


def _round_up(x, m):
    return (x + m - 1) // m * m


# ---------------------------------------------------------------------------
# Kernels
# ---------------------------------------------------------------------------
def _fused_kernel(x_ref, w1_ref, b1_ref, w2_ref, b2_ref, o_ref):
    """Single-axis grid (batch tiles); weights fully VMEM-resident."""
    x = x_ref[...].astype(jnp.bfloat16)                    # in-kernel cast
    h = jnp.dot(x, w1_ref[...], preferred_element_type=jnp.float32)
    h = h + b1_ref[...]
    h = jnp.maximum(h, 0.1 * h)                            # LeakyReLU(0.1)
    # Dropout(p=0.5): identity in eval mode
    out = jnp.dot(h.astype(jnp.bfloat16), w2_ref[...],
                  preferred_element_type=jnp.float32)
    out = out + b2_ref[...]
    o_ref[...] = out.astype(o_ref.dtype)


def _split_n_kernel(x_ref, w1_ref, b1_ref, w2_ref, b2_ref, o_ref, h_ref):
    """Two-axis grid (batch tiles x class tiles) for large classifier heads.

    The bottleneck activation h is computed once per batch tile (at j == 0)
    and kept in a VMEM scratch for all class tiles of that batch tile.
    """
    @pl.when(pl.program_id(1) == 0)
    def _():
        x = x_ref[...].astype(jnp.bfloat16)
        h = jnp.dot(x, w1_ref[...], preferred_element_type=jnp.float32)
        h = h + b1_ref[...]
        h = jnp.maximum(h, 0.1 * h)                        # LeakyReLU(0.1)
        h_ref[...] = h.astype(jnp.bfloat16)

    out = jnp.dot(h_ref[...], w2_ref[...], preferred_element_type=jnp.float32)
    out = out + b2_ref[...]
    o_ref[...] = out.astype(o_ref.dtype)


# ---------------------------------------------------------------------------
# One-time parameter preparation (do this ONCE and cache the result)
# ---------------------------------------------------------------------------
def prepare_params(params, *, eps=1e-5, tile_n=None, w2_vmem_budget=12 << 20):
    """Fold eval-mode BatchNorm into Linear1, pad to lane-dense shapes, cast
    weights to bf16 and pick the classifier tile width TN.  Pure function of
    the parameters -> run once, reuse across forward calls."""
    w1, b1 = params["w1"], params["b1"]
    gamma, beta = params["gamma"], params["beta"]
    rmean, rvar = params["running_mean"], params["running_var"]
    w2, b2 = params["w2"], params["b2"]

    input_dim, nb = w1.shape
    class_num = w2.shape[1]

    # ---- fold eval-mode BatchNorm1d into Linear1 ----
    inv_std = jax.lax.rsqrt(rvar + eps)
    scale = gamma * inv_std                                    # (nb,)
    w1_f = w1 * scale[None, :]                                 # (K, nb)
    b1_f = (b1 - rmean) * scale + beta                         # (nb,)

    # ---- lane-dense / MXU-friendly padded shapes ----
    Kp = _round_up(input_dim, 128)
    NBp = _round_up(nb, 128)
    Cp_full = _round_up(class_num, 128)

    # Classifier tile width: keep w2 fully resident when a (double-buffered)
    # bf16 slab fits the VMEM budget; otherwise tile the class axis (needed on
    # v7x / 64 MiB for very large heads).
    if tile_n is None:
        if NBp * Cp_full * 2 <= w2_vmem_budget:
            tile_n = Cp_full
        else:
            tile_n = max(128, (w2_vmem_budget // (4 * NBp)) // 128 * 128)
    TN = min(int(tile_n), Cp_full)
    Cp = _round_up(class_num, TN)

    def pad2(a, r, c):
        return jnp.pad(a, ((0, r - a.shape[0]), (0, c - a.shape[1])))

    return dict(
        w1=pad2(w1_f, Kp, NBp).astype(jnp.bfloat16),
        b1=jnp.pad(b1_f, (0, NBp - nb)).reshape(1, NBp).astype(jnp.float32),
        w2=pad2(w2, NBp, Cp).astype(jnp.bfloat16),
        b2=jnp.pad(b2, (0, Cp - class_num)).reshape(1, Cp).astype(jnp.float32),
        input_dim=input_dim, num_bottleneck=nb, class_num=class_num,
        Kp=Kp, NBp=NBp, Cp=Cp, TN=TN,
    )


# ---------------------------------------------------------------------------
# Forward
# ---------------------------------------------------------------------------
def classblock_direct(x, prepped, *, tile_b=256, out_dtype=jnp.float32):
    """x: (B, input_dim) float32 (or bf16). prepped: output of prepare_params."""
    B, input_dim = x.shape
    assert input_dim == prepped["input_dim"]
    Kp, NBp, Cp, TN = prepped["Kp"], prepped["NBp"], prepped["Cp"], prepped["TN"]
    class_num = prepped["class_num"]

    # ---- batch tiling ----
    Bp = _round_up(B, 8)
    if Bp <= tile_b:
        TB = Bp                       # single batch tile (full-array block)
    else:
        TB = tile_b
        Bp = _round_up(B, TB)

    # pad only when needed; do NOT cast here (bf16 cast happens in-kernel)
    if (Bp, Kp) != (B, input_dim):
        x = jnp.pad(x, ((0, Bp - B), (0, Kp - input_dim)))

    grid_b = Bp // TB
    grid_n = Cp // TN

    x_itemsize = jnp.dtype(x.dtype).itemsize
    out_itemsize = jnp.dtype(out_dtype).itemsize

    flops = 2 * Bp * (Kp * NBp + NBp * Cp)
    bytes_accessed = (Bp * Kp * x_itemsize + Kp * NBp * 2 + NBp * Cp * 2
                      + NBp * 4 + Cp * 4 + Bp * Cp * out_itemsize)
    cost = pl.CostEstimate(flops=flops, transcendentals=0,
                           bytes_accessed=bytes_accessed)

    # VMEM budget: 2x-buffered x/out tiles + resident w1/b1 + (2x) w2/b2 tile
    # + bf16 h scratch (split-N path).  Clamp to v7x's 64 MiB physical VMEM.
    vmem_need = (2 * TB * Kp * x_itemsize + 2 * TB * TN * out_itemsize
                 + Kp * NBp * 2 + NBp * 4
                 + 2 * NBp * TN * 2 + 2 * TN * 4
                 + TB * NBp * 2)
    vmem_limit = int(min(64 << 20, max(32 << 20, int(vmem_need * 1.5))))

    w1_p, b1_p = prepped["w1"], prepped["b1"]
    w2_p, b2_p = prepped["w2"], prepped["b2"]

    def run(weight_mode):
        kw = {} if weight_mode is None else {"pipeline_mode": weight_mode}
        if grid_n == 1:
            # fully fused path: all weights resident, batch-parallel grid
            return pl.pallas_call(
                _fused_kernel,
                out_shape=jax.ShapeDtypeStruct((Bp, Cp), out_dtype),
                grid=(grid_b,),
                in_specs=[
                    pl.BlockSpec((TB, Kp), lambda i: (i, 0)),          # x tile
                    pl.BlockSpec((Kp, NBp), lambda i: (0, 0), **kw),   # w1'
                    pl.BlockSpec((1, NBp), lambda i: (0, 0), **kw),    # b1'
                    pl.BlockSpec((NBp, TN), lambda i: (0, 0), **kw),   # w2
                    pl.BlockSpec((1, TN), lambda i: (0, 0), **kw),     # b2
                ],
                out_specs=pl.BlockSpec((TB, TN), lambda i: (i, 0)),
                compiler_params=pltpu.CompilerParams(
                    dimension_semantics=("parallel",),
                    vmem_limit_bytes=vmem_limit),
                cost_estimate=cost,
            )(x, w1_p, b1_p, w2_p, b2_p)
        else:
            # split-N path: tile the class axis; h kept in VMEM scratch
            return pl.pallas_call(
                _split_n_kernel,
                out_shape=jax.ShapeDtypeStruct((Bp, Cp), out_dtype),
                grid=(grid_b, grid_n),
                in_specs=[
                    pl.BlockSpec((TB, Kp), lambda i, j: (i, 0)),
                    pl.BlockSpec((Kp, NBp), lambda i, j: (0, 0), **kw),
                    pl.BlockSpec((1, NBp), lambda i, j: (0, 0), **kw),
                    pl.BlockSpec((NBp, TN), lambda i, j: (0, j)),
                    pl.BlockSpec((1, TN), lambda i, j: (0, j)),
                ],
                out_specs=pl.BlockSpec((TB, TN), lambda i, j: (i, j)),
                scratch_shapes=[pltpu.VMEM((TB, NBp), jnp.bfloat16)],
                compiler_params=pltpu.CompilerParams(
                    dimension_semantics=("parallel", "arbitrary"),
                    vmem_limit_bytes=vmem_limit),
                cost_estimate=cost,
            )(x, w1_p, b1_p, w2_p, b2_p)

    try:
        out_p = run(pl.Buffered(buffer_count=1))   # single-copy resident weights
    except Exception:
        out_p = run(None)                          # fallback: default buffering

    return out_p[:B, :class_num]


# ---------------------------------------------------------------------------
# Init / reference (mirrors the PyTorch module's initializers, eval mode)
# ---------------------------------------------------------------------------
def init_params(key, input_dim, num_bottleneck, class_num):
    k1, k2, k3 = jax.random.split(key, 3)
    # Linear1: kaiming_normal fan_out (gain=sqrt(2)) -> std = sqrt(2 / out_features)
    w1 = jax.random.normal(k1, (input_dim, num_bottleneck), jnp.float32) * \
        jnp.sqrt(2.0 / num_bottleneck)
    b1 = jnp.zeros((num_bottleneck,), jnp.float32)
    # BatchNorm1d: weight ~ N(1, 0.02), bias = 0, running stats (0, 1)
    gamma = 1.0 + 0.02 * jax.random.normal(k2, (num_bottleneck,), jnp.float32)
    beta = jnp.zeros((num_bottleneck,), jnp.float32)
    running_mean = jnp.zeros((num_bottleneck,), jnp.float32)
    running_var = jnp.ones((num_bottleneck,), jnp.float32)
    # classifier Linear: weight ~ N(0, 0.001), bias = 0
    w2 = 0.001 * jax.random.normal(k3, (num_bottleneck, class_num), jnp.float32)
    b2 = jnp.zeros((class_num,), jnp.float32)
    return dict(w1=w1, b1=b1, gamma=gamma, beta=beta,
                running_mean=running_mean, running_var=running_var,
                w2=w2, b2=b2)


def reference(x, p):
    h = x @ p["w1"] + p["b1"]
    h = (h - p["running_mean"]) / jnp.sqrt(p["running_var"] + 1e-5) * p["gamma"] + p["beta"]
    h = jnp.where(h > 0, h, 0.1 * h)
    return h @ p["w2"] + p["b2"]


if __name__ == "__main__":
    key = jax.random.PRNGKey(0)

    # ---- test 1: small shapes, fully fused single-axis path ----
    B, input_dim, num_bottleneck, class_num = 8, 64, 128, 16
    kx, kp, key = jax.random.split(key, 3)
    x = jax.random.normal(kx, (B, input_dim), jnp.float32)
    params = init_params(kp, input_dim, num_bottleneck, class_num)
    prepped = prepare_params(params)                 # one-time prep (cacheable)
    out = jax.block_until_ready(classblock_direct(x, prepped))
    ref = reference(x, params)
    assert out.shape == (B, class_num)
    assert jnp.allclose(out, ref, atol=5e-3, rtol=5e-2), \
        float(jnp.max(jnp.abs(out - ref)))

    # ---- test 2: multi-tile batch + split-N classifier path ----
    B2, class_num2 = 24, 200
    kx2, kp2 = jax.random.split(key)
    x2 = jax.random.normal(kx2, (B2, input_dim), jnp.float32)
    params2 = init_params(kp2, input_dim, num_bottleneck, class_num2)
    prepped2 = prepare_params(params2, tile_n=128)   # force the split-N path
    out2 = jax.block_until_ready(classblock_direct(x2, prepped2, tile_b=8))
    ref2 = reference(x2, params2)
    assert out2.shape == (B2, class_num2)
    assert jnp.allclose(out2, ref2, atol=5e-3, rtol=5e-2), \
        float(jnp.max(jnp.abs(out2 - ref2)))

    print("KERNEL_OK")
</pallas_src>

<mosaic_0001>
module attributes {stable_mosaic.version = 11 : i64} {
  func.func @_fused_kernel(%arg0: i32, %arg1: memref<8x128xf32, #tpu.memory_space<vmem>>, %arg2: memref<128x128xbf16, #tpu.memory_space<vmem>>, %arg3: memref<1x128xf32, #tpu.memory_space<vmem>>, %arg4: memref<128x128xbf16, #tpu.memory_space<vmem>>, %arg5: memref<1x128xf32, #tpu.memory_space<vmem>>, %arg6: memref<8x128xf32, #tpu.memory_space<vmem>>) attributes {dimension_semantics = [#tpu.dimension_semantics<parallel>], iteration_bounds = array<i64: 1>, scalar_prefetch = 0 : i64, scratch_operands = 0 : i64, tpu.core_type = #tpu.core_type<tc>, window_params = [{transform_indices = @transform_0, window_bounds = array<i64: 8, 128>}, {pipeline_mode = #tpu.pipeline_mode<synchronous>, transform_indices = @transform_1, window_bounds = array<i64: 128, 128>}, {pipeline_mode = #tpu.pipeline_mode<synchronous>, transform_indices = @transform_2, window_bounds = array<i64: 1, 128>}, {pipeline_mode = #tpu.pipeline_mode<synchronous>, transform_indices = @transform_3, window_bounds = array<i64: 128, 128>}, {pipeline_mode = #tpu.pipeline_mode<synchronous>, transform_indices = @transform_4, window_bounds = array<i64: 1, 128>}, {transform_indices = @transform_5, window_bounds = array<i64: 8, 128>}]} {
    %c0 = arith.constant 0 : index
    %c0_0 = arith.constant 0 : index
    %0 = vector.load %arg1[%c0, %c0_0] : memref<8x128xf32, #tpu.memory_space<vmem>>, vector<8x128xf32>
    %1 = arith.truncf %0 : vector<8x128xf32> to vector<8x128xbf16>
    %c0_1 = arith.constant 0 : index
    %c0_2 = arith.constant 0 : index
    %2 = vector.load %arg2[%c0_1, %c0_2] : memref<128x128xbf16, #tpu.memory_space<vmem>>, vector<128x128xbf16>
    %cst = arith.constant dense<0.000000e+00> : vector<8x128xf32>
    %3 = tpu.matmul %1, %2, %cst {dimension_numbers = #tpu.dot_dimension_numbers<[1], [0], [0], [1], [0, 0, 1, 1], [], []>} : vector<8x128xbf16>, vector<128x128xbf16>, vector<8x128xf32> -> vector<8x128xf32>
    %c0_3 = arith.constant 0 : index
    %c0_4 = arith.constant 0 : index
    %4 = vector.load %arg3[%c0_3, %c0_4] : memref<1x128xf32, #tpu.memory_space<vmem>>, vector<1x128xf32>
    %5 = vector.broadcast %4 : vector<1x128xf32> to vector<8x128xf32>
    %6 = arith.addf %3, %5 : vector<8x128xf32>
    %cst_5 = arith.constant 1.000000e-01 : f32
    %7 = vector.broadcast %cst_5 : f32 to vector<8x128xf32>
    %8 = arith.mulf %7, %6 : vector<8x128xf32>
    %9 = arith.maximumf %6, %8 : vector<8x128xf32>
    %10 = arith.truncf %9 : vector<8x128xf32> to vector<8x128xbf16>
    %c0_6 = arith.constant 0 : index
    %c0_7 = arith.constant 0 : index
    %11 = vector.load %arg4[%c0_6, %c0_7] : memref<128x128xbf16, #tpu.memory_space<vmem>>, vector<128x128xbf16>
    %cst_8 = arith.constant dense<0.000000e+00> : vector<8x128xf32>
    %12 = tpu.matmul %10, %11, %cst_8 {dimension_numbers = #tpu.dot_dimension_numbers<[1], [0], [0], [1], [0, 0, 1, 1], [], []>} : vector<8x128xbf16>, vector<128x128xbf16>, vector<8x128xf32> -> vector<8x128xf32>
    %c0_9 = arith.constant 0 : index
    %c0_10 = arith.constant 0 : index
    %13 = vector.load %arg5[%c0_9, %c0_10] : memref<1x128xf32, #tpu.memory_space<vmem>>, vector<1x128xf32>
    %14 = vector.broadcast %13 : vector<1x128xf32> to vector<8x128xf32>
    %15 = arith.addf %12, %14 : vector<8x128xf32>
    %c0_11 = arith.constant 0 : index
    %c0_12 = arith.constant 0 : index
    %16 = vector.load %arg6[%c0_11, %c0_12] : memref<8x128xf32, #tpu.memory_space<vmem>>, vector<8x128xf32>
    tpu.vector_store %arg6[%c0_11, %c0_12], %15 {strides = array<i32>} : memref<8x128xf32, #tpu.memory_space<vmem>>, vector<8x128xf32>,
    return
  }
  func.func @transform_0(%arg0: i32) -> (i32, i32) {
    %c0_i32 = arith.constant 0 : i32
    %c0_i32_0 = arith.constant 0 : i32
    return %arg0, %c0_i32 : i32, i32
  }
  func.func @transform_1(%arg0: i32) -> (i32, i32) {
    %c0_i32 = arith.constant 0 : i32
    %c0_i32_0 = arith.constant 0 : i32
    %c0_i32_1 = arith.constant 0 : i32
    return %c0_i32, %c0_i32_0 : i32, i32
  }
  func.func @transform_2(%arg0: i32) -> (i32, i32) {
    %c0_i32 = arith.constant 0 : i32
    %c0_i32_0 = arith.constant 0 : i32
    %c0_i32_1 = arith.constant 0 : i32
    return %c0_i32, %c0_i32_0 : i32, i32
  }
  func.func @transform_3(%arg0: i32) -> (i32, i32) {
    %c0_i32 = arith.constant 0 : i32
    %c0_i32_0 = arith.constant 0 : i32
    %c0_i32_1 = arith.constant 0 : i32
    return %c0_i32, %c0_i32_0 : i32, i32
  }
  func.func @transform_4(%arg0: i32) -> (i32, i32) {
    %c0_i32 = arith.constant 0 : i32
    %c0_i32_0 = arith.constant 0 : i32
    %c0_i32_1 = arith.constant 0 : i32
    return %c0_i32, %c0_i32_0 : i32, i32
  }
  func.func @transform_5(%arg0: i32) -> (i32, i32) {
    %c0_i32 = arith.constant 0 : i32
    %c0_i32_0 = arith.constant 0 : i32
    return %arg0, %c0_i32 : i32, i32
  }
}

module attributes {stable_mosaic.version = 11 : i64} {
  func.func @_fused_kernel(%arg0: i32, %arg1: memref<8x128xf32, #tpu.memory_space<vmem>>, %arg2: memref<128x128xbf16, #tpu.memory_space<vmem>>, %arg3: memref<1x128xf32, #tpu.memory_space<vmem>>, %arg4: memref<128x128xbf16, #tpu.memory_space<vmem>>, %arg5: memref<1x128xf32, #tpu.memory_space<vmem>>, %arg6: memref<8x128xf32, #tpu.memory_space<vmem>>) attributes {dimension_semantics = [#tpu.dimension_semantics<parallel>], iteration_bounds = array<i64: 1>, scalar_prefetch = 0 : i64, scratch_operands = 0 : i64, tpu.core_type = #tpu.core_type<tc>, window_params = [{transform_indices = @transform_0, window_bounds = array<i64: 8, 128>}, {pipeline_mode = #tpu.pipeline_mode<synchronous>, transform_indices = @transform_1, window_bounds = array<i64: 128, 128>}, {pipeline_mode = #tpu.pipeline_mode<synchronous>, transform_indices = @transform_2, window_bounds = array<i64: 1, 128>}, {pipeline_mode = #tpu.pipeline_mode<synchronous>, transform_indices = @transform_3, window_bounds = array<i64: 128, 128>}, {pipeline_mode = #tpu.pipeline_mode<synchronous>, transform_indices = @transform_4, window_bounds = array<i64: 1, 128>}, {transform_indices = @transform_5, window_bounds = array<i64: 8, 128>}]} {
    %c0 = arith.constant 0 : index
    %c0_0 = arith.constant 0 : index
    %0 = vector.load %arg1[%c0, %c0_0] : memref<8x128xf32, #tpu.memory_space<vmem>>, vector<8x128xf32>
    %1 = arith.truncf %0 : vector<8x128xf32> to vector<8x128xbf16>
    %c0_1 = arith.constant 0 : index
    %c0_2 = arith.constant 0 : index
    %2 = vector.load %arg2[%c0_1, %c0_2] : memref<128x128xbf16, #tpu.memory_space<vmem>>, vector<128x128xbf16>
    %cst = arith.constant dense<0.000000e+00> : vector<8x128xf32>
    %3 = tpu.matmul %1, %2, %cst {dimension_numbers = #tpu.dot_dimension_numbers<[1], [0], [0], [1], [0, 0, 1, 1], [], []>} : vector<8x128xbf16>, vector<128x128xbf16>, vector<8x128xf32> -> vector<8x128xf32>
    %c0_3 = arith.constant 0 : index
    %c0_4 = arith.constant 0 : index
    %4 = vector.load %arg3[%c0_3, %c0_4] : memref<1x128xf32, #tpu.memory_space<vmem>>, vector<1x128xf32>
    %5 = vector.broadcast %4 : vector<1x128xf32> to vector<8x128xf32>
    %6 = arith.addf %3, %5 : vector<8x128xf32>
    %cst_5 = arith.constant 1.000000e-01 : f32
    %7 = vector.broadcast %cst_5 : f32 to vector<8x128xf32>
    %8 = arith.mulf %7, %6 : vector<8x128xf32>
    %9 = arith.maximumf %6, %8 : vector<8x128xf32>
    %10 = arith.truncf %9 : vector<8x128xf32> to vector<8x128xbf16>
    %c0_6 = arith.constant 0 : index
    %c0_7 = arith.constant 0 : index
    %11 = vector.load %arg4[%c0_6, %c0_7] : memref<128x128xbf16, #tpu.memory_space<vmem>>, vector<128x128xbf16>
    %cst_8 = arith.constant dense<0.000000e+00> : vector<8x128xf32>
    %12 = tpu.matmul %10, %11, %cst_8 {dimension_numbers = #tpu.dot_dimension_numbers<[1], [0], [0], [1], [0, 0, 1, 1], [], []>} : vector<8x128xbf16>, vector<128x128xbf16>, vector<8x128xf32> -> vector<8x128xf32>
    %c0_9 = arith.constant 0 : index
    %c0_10 = arith.constant 0 : index
    %13 = vector.load %arg5[%c0_9, %c0_10] : memref<1x128xf32, #tpu.memory_space<vmem>>, vector<1x128xf32>
    %14 = vector.broadcast %13 : vector<1x128xf32> to vector<8x128xf32>
    %15 = arith.addf %12, %14 : vector<8x128xf32>
    %c0_11 = arith.constant 0 : index
    %c0_12 = arith.constant 0 : index
    %16 = vector.load %arg6[%c0_11, %c0_12] : memref<8x128xf32, #tpu.memory_space<vmem>>, vector<8x128xf32>
    tpu.vector_store %arg6[%c0_11, %c0_12], %15 {strides = array<i32>} : memref<8x128xf32, #tpu.memory_space<vmem>>, vector<8x128xf32>,
    return
  }
  func.func @transform_0(%arg0: i32) -> (i32, i32) {
    %c0_i32 = arith.constant 0 : i32
    %c0_i32_0 = arith.constant 0 : i32
    return %arg0, %c0_i32 : i32, i32
  }
  func.func @transform_1(%arg0: i32) -> (i32, i32) {
    %c0_i32 = arith.constant 0 : i32
    %c0_i32_0 = arith.constant 0 : i32
    %c0_i32_1 = arith.constant 0 : i32
    return %c0_i32, %c0_i32_0 : i32, i32
  }
  func.func @transform_2(%arg0: i32) -> (i32, i32) {
    %c0_i32 = arith.constant 0 : i32
    %c0_i32_0 = arith.constant 0 : i32
    %c0_i32_1 = arith.constant 0 : i32
    return %c0_i32, %c0_i32_0 : i32, i32
  }
  func.func @transform_3(%arg0: i32) -> (i32, i32) {
    %c0_i32 = arith.constant 0 : i32
    %c0_i32_0 = arith.constant 0 : i32
    %c0_i32_1 = arith.constant 0 : i32
    return %c0_i32, %c0_i32_0 : i32, i32
  }
  func.func @transform_4(%arg0: i32) -> (i32, i32) {
    %c0_i32 = arith.constant 0 : i32
    %c0_i32_0 = arith.constant 0 : i32
    %c0_i32_1 = arith.constant 0 : i32
    return %c0_i32, %c0_i32_0 : i32, i32
  }
  func.func @transform_5(%arg0: i32) -> (i32, i32) {
    %c0_i32 = arith.constant 0 : i32
    %c0_i32_0 = arith.constant 0 : i32
    return %arg0, %c0_i32 : i32, i32
  }
}

</mosaic_0001>

<bundles_post_ra>
// kernel: tpu_custom_call.1
= control target key start
LH: loop header
LB: loop body
LE: loop exit
PB: predicated region body
PF: predicated region fallthrough
CT: control target
= control target key end

     0   :  { %10 = vsyncpa [#allocation3], 0  ;;  %s547_s0 = inlined_call_operand.hbm [shape: f32[8,128], index: 0, kind: input, shape index: {}]   ;;  %s548_s1 = inlined_call_operand.hbm [shape: bf16[128,128], index: 1, kind: input, shape index: {}]   ;;  %s549_s2 = inlined_call_operand.vmem [shape: f32[1,128], index: 2, kind: input, shape index: {}]   ;;  %s550_s3 = inlined_call_operand.hbm [shape: bf16[128,128], index: 3, kind: input, shape index: {}]   ;;  %s551_s4 = inlined_call_operand.vmem [shape: f32[1,128], index: 4, kind: input, shape index: {}]   ;;  %s552_s5 = inlined_call_operand.hbm [shape: f32[8,128], index: 5, kind: output, shape index: {}]  }
   0x1   :  { %11 = vsyncpa [#allocation6], 0 }
   0x2   :  { %12 = vsyncpa [#allocation4], 0  ;;  %s491_s18 = smov [#allocation5]  }
   0x3   :  { %s28_s19 = sshll.u32 %s491_s18, 4  ;;  %s29_s19 = int_to_ptr.vmem [resolvable:$true] %s28_s19 }
   0x4   :  { %s413_s20 = scalar_lea.vmem %s29_s19, 1024  ;;  %p418_p1 = scmp.lt.s32.totalorder %s29_s19, %s29_s19 }
   0x5   :  { %p414_p0 = scmp.ne.s32.totalorder %s29_s19, %s413_s20  ;;  %p419_p2 = scmp.lt.s32.totalorder %s413_s20, %s413_s20 }
   0x7   :  { %p420_p3 = por %p419_p2, %p418_p1 }
   0x9   :  { %p421_p4 = pnand %p420_p3, %p414_p0 }
   0xb   :  { %424 = shalt.err (!%p421_p4)
}
   0xc   :  { %s492_s21 = smov 64   ;;  %s493_s22 = smov 4  }
   0xd   :  { %34 = dma.hbm_to_vmem [thread:$0]  %s548_s1, 1024, %s29_s19, [#allocation6], %s492_s21, %s492_s21, %s493_s22  }
   0xe   :  { %s494_s25 = smov [#allocation2]   ;;  %s495_s27 = smov [#allocation7]  }
   0xf   :  { %s19_s26 = sshll.u32 %s494_s25, 4  ;;  %s42_s28 = sshll.u32 %s495_s27, 4  ;;  %s20_s26 = int_to_ptr.vmem [resolvable:$true] %s19_s26  ;;  %s43_s28 = int_to_ptr.vmem [resolvable:$true] %s42_s28 }
  0x10   :  { %s433_s29 = scalar_lea.vmem %s20_s26, 128  ;;  %p438_p6 = scmp.lt.s32.totalorder %s20_s26, %s20_s26 }
  0x11   :  { %p434_p5 = scmp.ne.s32.totalorder %s20_s26, %s433_s29  ;;  %p439_p7 = scmp.lt.s32.totalorder %s433_s29, %s433_s29 }
  0x13   :  { %p440_p8 = por %p439_p7, %p438_p6 }
  0x15   :  { %p441_p9 = pnand %p440_p8, %p434_p5 }
  0x17   :  { %444 = shalt.err (!%p441_p9)
}
  0x18   :  { %22 = dma.hbm_to_vmem [thread:$0]  %s547_s0, 128, %s20_s26, [#allocation3]  }
  0x19   :  { %s453_s7 = scalar_lea.vmem %s43_s28, 1024  ;;  %p458_p11 = scmp.lt.s32.totalorder %s43_s28, %s43_s28 }
  0x1a   :  { %p454_p10 = scmp.ne.s32.totalorder %s43_s28, %s453_s7  ;;  %p459_p12 = scmp.lt.s32.totalorder %s453_s7, %s453_s7 }
  0x1c   :  { %p460_p13 = por %p459_p12, %p458_p11 }
  0x1e   :  { %p461_p0 = pnand %p460_p13, %p454_p10 }
  0x20   :  { %464 = shalt.err (!%p461_p0)
}
  0x21   :  { %48 = dma.hbm_to_vmem [thread:$0]  %s550_s3, 1024, %s43_s28, [#allocation6], %s492_s21, %s492_s21, %s493_s22  }
  0x22   :  { %485 = dma.done.wait [#allocation3], 128  }
  0x23   :  { %486 = vsyncadd [#allocation3], 4294967168 }
  0x24   :  { %487 = dma.done.wait [#allocation6], 2048  }
  0x25   :  { %488 = vsyncadd [#allocation6], 4294965248  ;;  %v496_v0 = vmov 0.0   ;;  %vm497_vm0 = vmmov 0   ;;  %v389_v1 = vld [vmem:[#allocation5 + $0x38] sm:$0xff]   ;;  %v390_v2 = vld [vmem:[#allocation5 + $0x30] sm:$0xff]  }
  0x26   :  { %341 = vmatprep.subr.bf16.mxu0 %v496_v0  ;;  %357 = vmatprep.mubr.msk.bf16.mxu0 %vm497_vm0, %v496_v0  ;;  %v391_v3 = vld [vmem:[#allocation5 + $0x28] sm:$0xff]   ;;  %v397_v4 = vld [vmem:[#allocation7 + $0x38] sm:$0xff]   ;;  %v392_v5 = vld [vmem:[#allocation5 + $0x20] sm:$0xff]   ;;  %s498_s11 = smov [#allocation8]  }
  0x27   :  { %361 = vmatprep.subr.bf16.mxu1 %v496_v0  ;;  %377 = vmatprep.mubr.msk.bf16.mxu1 %vm497_vm0, %v496_v0  ;;  %v398_v6 = vld [vmem:[#allocation7 + $0x30] sm:$0xff]   ;;  %v393_v7 = vld [vmem:[#allocation5 + $0x18] sm:$0xff]   ;;  %v399_v8 = vld [vmem:[#allocation7 + $0x28] sm:$0xff]   ;;  %s295_s12 = sshll.u32 %s498_s11, 4  ;;  %s296_s12 = int_to_ptr.vmem [resolvable:$true] %s295_s12 }
  0x28   :  { %342 = vmatpush3.bf16.msra.mxu0 %v389_v1  ;;  %362 = vmatpush3.bf16.msra.mxu1 %v397_v4  ;;  %v394_v9 = vld [vmem:[#allocation5 + $0x10] sm:$0xff]   ;;  %v400_v10 = vld [vmem:[#allocation7 + $0x20] sm:$0xff]   ;;  %v395_v11 = vld [vmem:[#allocation5 + $0x8] sm:$0xff]   ;;  %p470_p2 = scmp.lt.s32.totalorder %s296_s12, %s296_s12 }
  0x29   :  { %343 = vmatprep.subr.bf16.mxu0 %v496_v0  ;;  %363 = vmatprep.subr.bf16.mxu1 %v496_v0  ;;  %v401_v12 = vld [vmem:[#allocation7 + $0x18] sm:$0xff]   ;;  %v396_v13 = vld [vmem:[#allocation5] sm:$0xff]   ;;  %v402_v15 = vld [vmem:[#allocation7 + $0x10] sm:$0xff]  }
  0x2a   :  { %v61_v14 = vld [vmem:[#allocation2] sm:$0xff]  ;;  %v403_v17 = vld [vmem:[#allocation7 + $0x8] sm:$0xff]   ;;  %v404_v18 = vld [vmem:[#allocation7] sm:$0xff]  }
  0x2b   :  { %v62_v16 = vpack.c.bf16 %v61_v14, %v61_v14  ;;  %v305_v19 = vld [vmem:[%s549_s2] ss:$0 sm:$0xff]  ;;  %s465_s2 = scalar_lea.vmem %s296_s12, 128 }
  0x2c   :  { %344 = vmatpush3.bf16.msra.mxu0 %v390_v2  ;;  %364 = vmatpush3.bf16.msra.mxu1 %v398_v6  ;;  %v314_v28 = vld [vmem:[%s551_s4] ss:$0 sm:$0xff]  ;;  %p466_p1 = scmp.ne.s32.totalorder %s296_s12, %s465_s2  ;;  %p471_p3 = scmp.lt.s32.totalorder %s465_s2, %s465_s2 }
  0x2d   :  { %345 = vmatprep.subr.bf16.mxu0 %v496_v0  ;;  %365 = vmatprep.subr.bf16.mxu1 %v496_v0 }
  0x2e   :  { %p472_p4 = por %p471_p3, %p470_p2 }
  0x30   :  { %346 = vmatpush3.bf16.msra.mxu0 %v391_v3  ;;  %366 = vmatpush3.bf16.msra.mxu1 %v399_v8  ;;  %p473_p5 = pnand %p472_p4, %p466_p1 }
  0x31   :  { %347 = vmatprep.subr.bf16.mxu0 %v496_v0  ;;  %367 = vmatprep.subr.bf16.mxu1 %v496_v0 }
  0x34   :  { %348 = vmatpush3.bf16.msra.mxu0 %v392_v5  ;;  %368 = vmatpush3.bf16.msra.mxu1 %v400_v10 }
  0x35   :  { %349 = vmatprep.subr.bf16.mxu0 %v496_v0  ;;  %369 = vmatprep.subr.bf16.mxu1 %v496_v0 }
  0x38   :  { %350 = vmatpush3.bf16.msra.mxu0 %v393_v7  ;;  %370 = vmatpush3.bf16.msra.mxu1 %v401_v12 }
  0x39   :  { %351 = vmatprep.subr.bf16.mxu0 %v496_v0  ;;  %371 = vmatprep.subr.bf16.mxu1 %v496_v0 }
  0x3c   :  { %352 = vmatpush3.bf16.msra.mxu0 %v394_v9  ;;  %372 = vmatpush3.bf16.msra.mxu1 %v402_v15 }
  0x3d   :  { %353 = vmatprep.subr.bf16.mxu0 %v496_v0  ;;  %373 = vmatprep.subr.bf16.mxu1 %v496_v0 }
  0x40   :  { %354 = vmatpush3.bf16.msra.mxu0 %v395_v11  ;;  %374 = vmatpush3.bf16.msra.mxu1 %v403_v17 }
  0x41   :  { %355 = vmatprep.subr.bf16.mxu0 %v496_v0  ;;  %375 = vmatprep.subr.bf16.mxu1 %v496_v0 }
  0x44   :  { %356 = vmatpush3.bf16.msra.mxu0 %v396_v13  ;;  %376 = vmatpush3.bf16.msra.mxu1 %v404_v18 }
  0x47   :  { %358 = vmatmul.mubr.bf16.vlgmr.msra.gmra.mxu0 %v62_v16 }
 0x107   :  { %v168_v20 = vpop.f32.mrf.mxu0 }
 0x108   :  { %v169_v21 = vadd.f32 %v305_v19, %v168_v20 }
 0x109   :  { %v359_v22 = vpop.f32.mrf.mxu0 }
 0x10a   :  { %v174_v23 = vmul.f32 0.1, %v169_v21 }
 0x10b   :  { %v171_v24 = vpop.f32.mrf.mxu0 }
 0x10c   :  { %v175_v25 = vmax.f32 %v169_v21, %v174_v23 }
 0x10d   :  { %v360_v26 = vpop.f32.mrf.mxu0 }
 0x10e   :  { %v176_v27 = vpack.c.bf16 %v175_v25, %v175_v25 }
 0x110   :  { %378 = vmatmul.mubr.bf16.vlgmr.msra.gmra.mxu1 %v176_v27 }
 0x1d0   :  { %v282_v29 = vpop.f32.mrf.mxu1 }
 0x1d1   :  { %v283_v30 = vadd.f32 %v314_v28, %v282_v29 }
 0x1d2   :  { %v379_v31 = vpop.f32.mrf.mxu1 }
 0x1d3   :  { %288 = vst [vmem:[#allocation8] sm:$0xff] %v283_v30 }
 0x1d4   :  { %v285_v32 = vpop.f32.mrf.mxu1 }
 0x1d5   :  { %476 = shalt.err (!%p473_p5)
}
 0x1d6   :  { %298 = dma.vmem_to_hbm [thread:$0]  %s296_s12, 128, %s552_s5, [#allocation4]   ;;  %v380_v33 = vpop.f32.mrf.mxu1 }
 0x1d7   :  { %489 = dma.done.wait [#allocation4], 128  }
 0x1d8   :  { %490 = vsyncadd [#allocation4], 4294967168 }
 0x1d9   :  { %302 = vsyncpa [#allocation3], 1 }
 0x1da   :  { %303 = vsyncpa [#allocation6], 1 }
 0x1db   :  { %304 = vsyncpa [#allocation4], 1 }

// kernel: tpu_custom_call.1
= control target key start
LH: loop header
LB: loop body
LE: loop exit
PB: predicated region body
PF: predicated region fallthrough
CT: control target
= control target key end

     0   :  { %10 = vsyncpa [#allocation3], 0  ;;  %s547_s0 = inlined_call_operand.hbm [shape: f32[8,128], index: 0, kind: input, shape index: {}]   ;;  %s548_s1 = inlined_call_operand.hbm [shape: bf16[128,128], index: 1, kind: input, shape index: {}]   ;;  %s549_s2 = inlined_call_operand.vmem [shape: f32[1,128], index: 2, kind: input, shape index: {}]   ;;  %s550_s3 = inlined_call_operand.hbm [shape: bf16[128,128], index: 3, kind: input, shape index: {}]   ;;  %s551_s4 = inlined_call_operand.vmem [shape: f32[1,128], index: 4, kind: input, shape index: {}]   ;;  %s552_s5 = inlined_call_operand.hbm [shape: f32[8,128], index: 5, kind: output, shape index: {}]  }
   0x1   :  { %11 = vsyncpa [#allocation6], 0 }
   0x2   :  { %12 = vsyncpa [#allocation4], 0  ;;  %s491_s18 = smov [#allocation5]  }
   0x3   :  { %s28_s19 = sshll.u32 %s491_s18, 4  ;;  %s29_s19 = int_to_ptr.vmem [resolvable:$true] %s28_s19 }
   0x4   :  { %s413_s20 = scalar_lea.vmem %s29_s19, 1024  ;;  %p418_p1 = scmp.lt.s32.totalorder %s29_s19, %s29_s19 }
   0x5   :  { %p414_p0 = scmp.ne.s32.totalorder %s29_s19, %s413_s20  ;;  %p419_p2 = scmp.lt.s32.totalorder %s413_s20, %s413_s20 }
   0x7   :  { %p420_p3 = por %p419_p2, %p418_p1 }
   0x9   :  { %p421_p4 = pnand %p420_p3, %p414_p0 }
   0xb   :  { %424 = shalt.err (!%p421_p4)
}
   0xc   :  { %s492_s21 = smov 64   ;;  %s493_s22 = smov 4  }
   0xd   :  { %34 = dma.hbm_to_vmem [thread:$0]  %s548_s1, 1024, %s29_s19, [#allocation6], %s492_s21, %s492_s21, %s493_s22  }
   0xe   :  { %s494_s25 = smov [#allocation2]   ;;  %s495_s27 = smov [#allocation7]  }
   0xf   :  { %s19_s26 = sshll.u32 %s494_s25, 4  ;;  %s42_s28 = sshll.u32 %s495_s27, 4  ;;  %s20_s26 = int_to_ptr.vmem [resolvable:$true] %s19_s26  ;;  %s43_s28 = int_to_ptr.vmem [resolvable:$true] %s42_s28 }
  0x10   :  { %s433_s29 = scalar_lea.vmem %s20_s26, 128  ;;  %p438_p6 = scmp.lt.s32.totalorder %s20_s26, %s20_s26 }
  0x11   :  { %p434_p5 = scmp.ne.s32.totalorder %s20_s26, %s433_s29  ;;  %p439_p7 = scmp.lt.s32.totalorder %s433_s29, %s433_s29 }
  0x13   :  { %p440_p8 = por %p439_p7, %p438_p6 }
  0x15   :  { %p441_p9 = pnand %p440_p8, %p434_p5 }
  0x17   :  { %444 = shalt.err (!%p441_p9)
}
  0x18   :  { %22 = dma.hbm_to_vmem [thread:$0]  %s547_s0, 128, %s20_s26, [#allocation3]  }
  0x19   :  { %s453_s7 = scalar_lea.vmem %s43_s28, 1024  ;;  %p458_p11 = scmp.lt.s32.totalorder %s43_s28, %s43_s28 }
  0x1a   :  { %p454_p10 = scmp.ne.s32.totalorder %s43_s28, %s453_s7  ;;  %p459_p12 = scmp.lt.s32.totalorder %s453_s7, %s453_s7 }
  0x1c   :  { %p460_p13 = por %p459_p12, %p458_p11 }
  0x1e   :  { %p461_p0 = pnand %p460_p13, %p454_p10 }
  0x20   :  { %464 = shalt.err (!%p461_p0)
}
  0x21   :  { %48 = dma.hbm_to_vmem [thread:$0]  %s550_s3, 1024, %s43_s28, [#allocation6], %s492_s21, %s492_s21, %s493_s22  }
  0x22   :  { %485 = dma.done.wait [#allocation3], 128  }
  0x23   :  { %486 = vsyncadd [#allocation3], 4294967168 }
  0x24   :  { %487 = dma.done.wait [#allocation6], 2048  }
  0x25   :  { %488 = vsyncadd [#allocation6], 4294965248  ;;  %v496_v0 = vmov 0.0   ;;  %vm497_vm0 = vmmov 0   ;;  %v389_v1 = vld [vmem:[#allocation5 + $0x38] sm:$0xff]   ;;  %v390_v2 = vld [vmem:[#allocation5 + $0x30] sm:$0xff]  }
  0x26   :  { %341 = vmatprep.subr.bf16.mxu0 %v496_v0  ;;  %357 = vmatprep.mubr.msk.bf16.mxu0 %vm497_vm0, %v496_v0  ;;  %v391_v3 = vld [vmem:[#allocation5 + $0x28] sm:$0xff]   ;;  %v397_v4 = vld [vmem:[#allocation7 + $0x38] sm:$0xff]   ;;  %v392_v5 = vld [vmem:[#allocation5 + $0x20] sm:$0xff]   ;;  %s498_s11 = smov [#allocation8]  }
  0x27   :  { %361 = vmatprep.subr.bf16.mxu1 %v496_v0  ;;  %377 = vmatprep.mubr.msk.bf16.mxu1 %vm497_vm0, %v496_v0  ;;  %v398_v6 = vld [vmem:[#allocation7 + $0x30] sm:$0xff]   ;;  %v393_v7 = vld [vmem:[#allocation5 + $0x18] sm:$0xff]   ;;  %v399_v8 = vld [vmem:[#allocation7 + $0x28] sm:$0xff]   ;;  %s295_s12 = sshll.u32 %s498_s11, 4  ;;  %s296_s12 = int_to_ptr.vmem [resolvable:$true] %s295_s12 }
  0x28   :  { %342 = vmatpush3.bf16.msra.mxu0 %v389_v1  ;;  %362 = vmatpush3.bf16.msra.mxu1 %v397_v4  ;;  %v394_v9 = vld [vmem:[#allocation5 + $0x10] sm:$0xff]   ;;  %v400_v10 = vld [vmem:[#allocation7 + $0x20] sm:$0xff]   ;;  %v395_v11 = vld [vmem:[#allocation5 + $0x8] sm:$0xff]   ;;  %p470_p2 = scmp.lt.s32.totalorder %s296_s12, %s296_s12 }
  0x29   :  { %343 = vmatprep.subr.bf16.mxu0 %v496_v0  ;;  %363 = vmatprep.subr.bf16.mxu1 %v496_v0  ;;  %v401_v12 = vld [vmem:[#allocation7 + $0x18] sm:$0xff]   ;;  %v396_v13 = vld [vmem:[#allocation5] sm:$0xff]   ;;  %v402_v15 = vld [vmem:[#allocation7 + $0x10] sm:$0xff]  }
  0x2a   :  { %v61_v14 = vld [vmem:[#allocation2] sm:$0xff]  ;;  %v403_v17 = vld [vmem:[#allocation7 + $0x8] sm:$0xff]   ;;  %v404_v18 = vld [vmem:[#allocation7] sm:$0xff]  }
  0x2b   :  { %v62_v16 = vpack.c.bf16 %v61_v14, %v61_v14  ;;  %v305_v19 = vld [vmem:[%s549_s2] ss:$0 sm:$0xff]  ;;  %s465_s2 = scalar_lea.vmem %s296_s12, 128 }
  0x2c   :  { %344 = vmatpush3.bf16.msra.mxu0 %v390_v2  ;;  %364 = vmatpush3.bf16.msra.mxu1 %v398_v6  ;;  %v314_v28 = vld [vmem:[%s551_s4] ss:$0 sm:$0xff]  ;;  %p466_p1 = scmp.ne.s32.totalorder %s296_s12, %s465_s2  ;;  %p471_p3 = scmp.lt.s32.totalorder %s465_s2, %s465_s2 }
  0x2d   :  { %345 = vmatprep.subr.bf16.mxu0 %v496_v0  ;;  %365 = vmatprep.subr.bf16.mxu1 %v496_v0 }
  0x2e   :  { %p472_p4 = por %p471_p3, %p470_p2 }
  0x30   :  { %346 = vmatpush3.bf16.msra.mxu0 %v391_v3  ;;  %366 = vmatpush3.bf16.msra.mxu1 %v399_v8  ;;  %p473_p5 = pnand %p472_p4, %p466_p1 }
  0x31   :  { %347 = vmatprep.subr.bf16.mxu0 %v496_v0  ;;  %367 = vmatprep.subr.bf16.mxu1 %v496_v0 }
  0x34   :  { %348 = vmatpush3.bf16.msra.mxu0 %v392_v5  ;;  %368 = vmatpush3.bf16.msra.mxu1 %v400_v10 }
  0x35   :  { %349 = vmatprep.subr.bf16.mxu0 %v496_v0  ;;  %369 = vmatprep.subr.bf16.mxu1 %v496_v0 }
  0x38   :  { %350 = vmatpush3.bf16.msra.mxu0 %v393_v7  ;;  %370 = vmatpush3.bf16.msra.mxu1 %v401_v12 }
  0x39   :  { %351 = vmatprep.subr.bf16.mxu0 %v496_v0  ;;  %371 = vmatprep.subr.bf16.mxu1 %v496_v0 }
  0x3c   :  { %352 = vmatpush3.bf16.msra.mxu0 %v394_v9  ;;  %372 = vmatpush3.bf16.msra.mxu1 %v402_v15 }
  0x3d   :  { %353 = vmatprep.subr.bf16.mxu0 %v496_v0  ;;  %373 = vmatprep.subr.bf16.mxu1 %v496_v0 }
  0x40   :  { %354 = vmatpush3.bf16.msra.mxu0 %v395_v11  ;;  %374 = vmatpush3.bf16.msra.mxu1 %v403_v17 }
  0x41   :  { %355 = vmatprep.subr.bf16.mxu0 %v496_v0  ;;  %375 = vmatprep.subr.bf16.mxu1 %v496_v0 }
  0x44   :  { %356 = vmatpush3.bf16.msra.mxu0 %v396_v13  ;;  %376 = vmatpush3.bf16.msra.mxu1 %v404_v18 }
  0x47   :  { %358 = vmatmul.mubr.bf16.vlgmr.msra.gmra.mxu0 %v62_v16 }
 0x107   :  { %v168_v20 = vpop.f32.mrf.mxu0 }
 0x108   :  { %v169_v21 = vadd.f32 %v305_v19, %v168_v20 }
 0x109   :  { %v359_v22 = vpop.f32.mrf.mxu0 }
 0x10a   :  { %v174_v23 = vmul.f32 0.1, %v169_v21 }
 0x10b   :  { %v171_v24 = vpop.f32.mrf.mxu0 }
 0x10c   :  { %v175_v25 = vmax.f32 %v169_v21, %v174_v23 }
 0x10d   :  { %v360_v26 = vpop.f32.mrf.mxu0 }
 0x10e   :  { %v176_v27 = vpack.c.bf16 %v175_v25, %v175_v25 }
 0x110   :  { %378 = vmatmul.mubr.bf16.vlgmr.msra.gmra.mxu1 %v176_v27 }
 0x1d0   :  { %v282_v29 = vpop.f32.mrf.mxu1 }
 0x1d1   :  { %v283_v30 = vadd.f32 %v314_v28, %v282_v29 }
 0x1d2   :  { %v379_v31 = vpop.f32.mrf.mxu1 }
 0x1d3   :  { %288 = vst [vmem:[#allocation8] sm:$0xff] %v283_v30 }
 0x1d4   :  { %v285_v32 = vpop.f32.mrf.mxu1 }
 0x1d5   :  { %476 = shalt.err (!%p473_p5)
}
 0x1d6   :  { %298 = dma.vmem_to_hbm [thread:$0]  %s296_s12, 128, %s552_s5, [#allocation4]   ;;  %v380_v33 = vpop.f32.mrf.mxu1 }
 0x1d7   :  { %489 = dma.done.wait [#allocation4], 128  }
 0x1d8   :  { %490 = vsyncadd [#allocation4], 4294967168 }
 0x1d9   :  { %302 = vsyncpa [#allocation3], 1 }
 0x1da   :  { %303 = vsyncpa [#allocation6], 1 }
 0x1db   :  { %304 = vsyncpa [#allocation4], 1 }

</bundles_post_ra>
